<compile_context>
chip_gen: v7x
topology: tpu7x:2x2x1
jax: 0.10.0
libtpu: 0.0.40
codegen_flags: <defaults>
</compile_context>

<pallas_src>
import functools

import jax
import jax.numpy as jnp
from jax.experimental import pallas as pl
from jax.experimental.pallas import tpu as pltpu


def _round_up(x, m):
    return ((x + m - 1) // m) * m


def _sgc_kernel(x_ref, w_ref, b_ref, o_ref):
    # x_ref : (tm_rows, p*K)  lane-packed node-feature tile
    # w_ref : (p*K, p*N)      block-diagonal weight, resident every step
    # b_ref : (1, p*N)        tiled bias row, broadcast over tile rows
    # o_ref : (tm_rows, p*N)  lane-packed output tile
    acc = jnp.dot(x_ref[...], w_ref[...], preferred_element_type=jnp.float32)
    o_ref[...] = (acc + b_ref[...]).astype(o_ref.dtype)


@functools.partial(jax.jit, static_argnames=("tm",))
def sgc_forward(x, weight, bias, *, tm=16384):
    """y = x @ weight.T + bias, computed with a Pallas TPU kernel.

    x:      (M, n_feats)
    weight: (n_classes, n_feats)   -- PyTorch nn.Linear layout
    bias:   (n_classes,)
    tm:     row tile in (unpacked) node rows.
    """
    M, K = x.shape
    N = weight.shape[0]
    assert weight.shape[1] == K

    itemsize = jnp.dtype(x.dtype).itemsize

    # Lane-pack by 8 (one sublane group per packed row) when the output lane
    # dim would otherwise be sparse and the block-diagonal weight stays small.
    p = 8 if (N < 128 and (8 * K) * (8 * N) * 4 <= (8 << 20)) else 1

    # Pad the node axis only to a multiple of the pack factor (<= p-1 rows),
    # never to a multiple of the row tile.
    M_p = _round_up(M, p)
    x_p = x if M_p == M else jnp.pad(x, ((0, M_p - M), (0, 0)))

    Mr = M_p // p          # packed rows
    Kp = p * K             # packed contraction dim (lane-dense)
    Np = p * N             # packed output lanes (lane-dense)

    x_pk = x_p.reshape(Mr, Kp)                          # free row-major reshape
    wT = weight.T.astype(x.dtype)                       # (K, N)
    w_blk = jnp.kron(jnp.eye(p, dtype=x.dtype), wT)     # (Kp, Np) block-diag
    b_pk = jnp.tile(bias.astype(jnp.float32), p).reshape(1, Np)

    # ---- Row tile (in packed rows) -------------------------------------
    tm_rows = max(1, int(tm) // p)
    # v7x: keep >= ~4 grid steps for large M so both TensorCores get >= 2
    # pipelined steps each (megacore sharding via "parallel").
    if M_p >= 4 * 8192:
        tm_rows = min(tm_rows, _round_up(pl.cdiv(Mr, 4), 8))
    if tm_rows >= Mr:
        tm_rows = Mr                         # single block == full array dim
    else:
        tm_rows = max(8, (tm_rows // 8) * 8)  # sublane-aligned tile

    grid = (pl.cdiv(Mr, tm_rows),)           # ragged last block handled by Pallas

    # ---- VMEM budget (packed = lane-dense, so no hidden 128-lane pad) ---
    bytes_x = tm_rows * Kp * itemsize
    bytes_o = tm_rows * Np * itemsize
    bytes_w = Kp * Np * 4
    bytes_b = 8 * max(Np, 128) * 4
    vmem_needed = 2 * (bytes_x + bytes_o + bytes_w + bytes_b)  # double-buffered

    try:
        cap = int(0.75 * pltpu.get_tpu_info().vmem_capacity_bytes)
    except Exception:
        cap = 48 * 1024 * 1024               # safe on v5e/v6e/v7x
    vmem_limit = int(min(max(int(1.5 * vmem_needed), 32 * 1024 * 1024), cap))

    out_pk = pl.pallas_call(
        _sgc_kernel,
        out_shape=jax.ShapeDtypeStruct((Mr, Np), x.dtype),
        grid_spec=pltpu.PrefetchScalarGridSpec(
            num_scalar_prefetch=0,
            grid=grid,
            in_specs=[
                pl.BlockSpec((tm_rows, Kp), lambda i: (i, 0)),  # x tile (streamed)
                pl.BlockSpec((Kp, Np), lambda i: (0, 0)),       # weight (resident)
                pl.BlockSpec((1, Np), lambda i: (0, 0)),        # bias   (resident)
            ],
            out_specs=pl.BlockSpec((tm_rows, Np), lambda i: (i, 0)),
        ),
        compiler_params=pltpu.CompilerParams(
            dimension_semantics=("parallel",),
            vmem_limit_bytes=vmem_limit,
        ),
        cost_estimate=pl.CostEstimate(
            flops=2 * Mr * Kp * Np,
            transcendentals=0,
            bytes_accessed=itemsize * (Mr * Kp + Mr * Np) + 4 * (Kp * Np + Np),
        ),
    )(x_pk, w_blk, b_pk)

    y = out_pk.reshape(M_p, N)               # free row-major reshape back
    return y if M_p == M else y[:M]


if __name__ == "__main__":
    # Small, deterministic example consistent with SGC(n_feats, n_classes).
    # n_nodes is NOT a multiple of 8 to exercise the tiny pad-to-8 path and
    # ragged last blocks.
    n_nodes, n_feats, n_classes = 203, 32, 16

    key = jax.random.PRNGKey(0)
    kx, kw, kb = jax.random.split(key, 3)

    x = jax.random.normal(kx, (n_nodes, n_feats), dtype=jnp.float32)

    # Deterministic init mimicking nn.Linear default: U(-1/sqrt(fan_in), ...)
    bound = 1.0 / jnp.sqrt(jnp.float32(n_feats))
    weight = jax.random.uniform(
        kw, (n_classes, n_feats), dtype=jnp.float32, minval=-bound, maxval=bound
    )
    bias = jax.random.uniform(
        kb, (n_classes,), dtype=jnp.float32, minval=-bound, maxval=bound
    )

    y_ref = x @ weight.T + bias

    # 1) Default (large-tile) path: single grid step.
    y = jax.block_until_ready(sgc_forward(x, weight, bias))
    assert y.shape == (n_nodes, n_classes)
    assert jnp.allclose(y, y_ref, atol=1e-5, rtol=1e-5), "mismatch (default tm)"

    # 2) Multi-step grid path (several tiles + ragged last block).
    y2 = jax.block_until_ready(sgc_forward(x, weight, bias, tm=64))
    assert jnp.allclose(y2, y_ref, atol=1e-5, rtol=1e-5), "mismatch (tm=64)"

    print("KERNEL_OK")
</pallas_src>

<mosaic_0001>
module attributes {stable_mosaic.version = 11 : i64} {
  func.func @_sgc_kernel(%arg0: i32, %arg1: memref<26x256xf32, #tpu.memory_space<vmem>>, %arg2: memref<256x128xf32, #tpu.memory_space<vmem>>, %arg3: memref<1x128xf32, #tpu.memory_space<vmem>>, %arg4: memref<26x128xf32, #tpu.memory_space<vmem>>) attributes {dimension_semantics = [#tpu.dimension_semantics<parallel>], iteration_bounds = array<i64: 1>, scalar_prefetch = 0 : i64, scratch_operands = 0 : i64, tpu.core_type = #tpu.core_type<tc>, window_params = [{transform_indices = @transform_0, window_bounds = array<i64: 26, 256>}, {pipeline_mode = #tpu.pipeline_mode<synchronous>, transform_indices = @transform_1, window_bounds = array<i64: 256, 128>}, {pipeline_mode = #tpu.pipeline_mode<synchronous>, transform_indices = @transform_2, window_bounds = array<i64: 1, 128>}, {transform_indices = @transform_3, window_bounds = array<i64: 26, 128>}]} {
    %c0 = arith.constant 0 : index
    %c0_0 = arith.constant 0 : index
    %0 = vector.load %arg1[%c0, %c0_0] : memref<26x256xf32, #tpu.memory_space<vmem>>, vector<26x256xf32>
    %c0_1 = arith.constant 0 : index
    %c0_2 = arith.constant 0 : index
    %1 = vector.load %arg2[%c0_1, %c0_2] : memref<256x128xf32, #tpu.memory_space<vmem>>, vector<256x128xf32>
    %cst = arith.constant dense<0.000000e+00> : vector<26x128xf32>
    %2 = tpu.matmul %0, %1, %cst {dimension_numbers = #tpu.dot_dimension_numbers<[1], [0], [0], [1], [0, 0, 1, 1], [], []>} : vector<26x256xf32>, vector<256x128xf32>, vector<26x128xf32> -> vector<26x128xf32>
    %c0_3 = arith.constant 0 : index
    %c0_4 = arith.constant 0 : index
    %3 = vector.load %arg3[%c0_3, %c0_4] : memref<1x128xf32, #tpu.memory_space<vmem>>, vector<1x128xf32>
    %4 = vector.broadcast %3 : vector<1x128xf32> to vector<26x128xf32>
    %5 = arith.addf %2, %4 : vector<26x128xf32>
    %c0_5 = arith.constant 0 : index
    %c0_6 = arith.constant 0 : index
    %6 = vector.load %arg4[%c0_5, %c0_6] : memref<26x128xf32, #tpu.memory_space<vmem>>, vector<26x128xf32>
    tpu.vector_store %arg4[%c0_5, %c0_6], %5 {strides = array<i32>} : memref<26x128xf32, #tpu.memory_space<vmem>>, vector<26x128xf32>,
    return
  }
  func.func @transform_0(%arg0: i32) -> (i32, i32) {
    %c0_i32 = arith.constant 0 : i32
    %c0_i32_0 = arith.constant 0 : i32
    return %arg0, %c0_i32 : i32, i32
  }
  func.func @transform_1(%arg0: i32) -> (i32, i32) {
    %c0_i32 = arith.constant 0 : i32
    %c0_i32_0 = arith.constant 0 : i32
    %c0_i32_1 = arith.constant 0 : i32
    return %c0_i32, %c0_i32_0 : i32, i32
  }
  func.func @transform_2(%arg0: i32) -> (i32, i32) {
    %c0_i32 = arith.constant 0 : i32
    %c0_i32_0 = arith.constant 0 : i32
    %c0_i32_1 = arith.constant 0 : i32
    return %c0_i32, %c0_i32_0 : i32, i32
  }
  func.func @transform_3(%arg0: i32) -> (i32, i32) {
    %c0_i32 = arith.constant 0 : i32
    %c0_i32_0 = arith.constant 0 : i32
    return %arg0, %c0_i32 : i32, i32
  }
}

</mosaic_0001>

<bundles_post_ra>
// kernel: tile.8
= control target key start
LH: loop header
LB: loop body
LE: loop exit
PB: predicated region body
PF: predicated region fallthrough
CT: control target
= control target key end

     0   :  { %s22_s0 = inlined_call_operand.vmem [shape: f32[16], index: 0, kind: input, shape index: {}]   ;;  %s23_s1 = inlined_call_operand.vmem [shape: f32[8,16], index: 1, kind: output, shape index: {}]  }
   0x1   :  { %v4_v0 = vld [vmem:[%s22_s0] ss:$0 sm:$0xff] }
   0x2   :  { %5 = vst [vmem:[%s23_s1] sm:$0xff] %v4_v0 }

// kernel: tile.9
= control target key start
LH: loop header
LB: loop body
LE: loop exit
PB: predicated region body
PF: predicated region fallthrough
CT: control target
= control target key end

     0   :  { %s67_s10 = smov 112   ;;  %s68_s11 = smov 80   ;;  %vm3_vm0 = vcmask 130048   ;;  %vm9_vm1 = vcmask 1048448   ;;  %vm15_vm2 = vcmask 917248   ;;  %vm21_vm3 = vcmask 786048   ;;  %s111_s0 = inlined_call_operand.vmem [shape: f32[8,16], index: 0, kind: input, shape index: {}]   ;;  %s112_s1 = inlined_call_operand.vmem [shape: f32[1,128], index: 1, kind: output, shape index: {}]  }
   0x1   :  { %v53_v0 = vld [vmem:[%s111_s0 + $0x7] sm:$0x1]   ;;  %v55_v1 = vld [vmem:[%s111_s0 + $0x5] sm:$0x1]   ;;  %v54_v2 = vld [vmem:[%s111_s0 + $0x6] sm:$0x1]  }
   0x2   :  { %7 = vrot.lane.b32.xlu0 %v53_v0, %s67_s10  ;;  %19 = vrot.lane.b32.xlu1 %v55_v1, %s68_s11  ;;  %v56_v3 = vld [vmem:[%s111_s0 + $0x4] sm:$0x1]   ;;  %v2_v4 = vld [vmem:[%s111_s0] sm:$0x1]   ;;  %s69_s18 = smov 96   ;;  %s70_s19 = smov 64  }
   0x3   :  { %4 = vst.msk [vmem:[#allocation0] sm:$0x1] %vm3_vm0, %v2_v4   ;;  %v57_v5 = vld [vmem:[%s111_s0 + $0x3] sm:$0x1]   ;;  %v58_v6 = vld [vmem:[%s111_s0 + $0x2] sm:$0x1]  }
   0x4   :  { %s71_s24 = smov 48   ;;  %s72_s25 = smov 32   ;;  %v59_v7 = vld [vmem:[%s111_s0 + $0x1] sm:$0x1]   ;;  %vm27_vm4 = vcmask 654848   ;;  %vm33_vm5 = vcmask 523648  }
   0x5   :  { %s73_s0 = smov 16   ;;  %vm39_vm6 = vcmask 392448   ;;  %vm45_vm7 = vcmask 261248  }
   0x6   :  { %13 = vrot.lane.b32.xlu0 %v54_v2, %s69_s18  ;;  %25 = vrot.lane.b32.xlu1 %v56_v3, %s70_s19 }
   0xa   :  { %31 = vrot.lane.b32.xlu0 %v57_v5, %s71_s24  ;;  %37 = vrot.lane.b32.xlu1 %v58_v6, %s72_s25 }
   0xe   :  { %43 = vrot.lane.b32.xlu0 %v59_v7, %s73_s0 }
  0x74   :  { %v8_v8 = vpop.permute.xlu0 %7   ;;  %v20_v9 = vpop.permute.xlu1 %19  }
  0x75   :  { %10 = vst.msk [vmem:[#allocation0] sm:$0x1] %vm9_vm1, %v8_v8  }
  0x78   :  { %v14_v10 = vpop.permute.xlu0 %13   ;;  %v26_v11 = vpop.permute.xlu1 %25  }
  0x79   :  { %16 = vst.msk [vmem:[#allocation0] sm:$0x1] %vm15_vm2, %v14_v10  }
  0x7a   :  { %22 = vst.msk [vmem:[#allocation0] sm:$0x1] %vm21_vm3, %v20_v9  }
  0x7b   :  { %28 = vst.msk [vmem:[#allocation0] sm:$0x1] %vm27_vm4, %v26_v11  }
  0x7c   :  { %v32_v12 = vpop.permute.xlu0 %31   ;;  %v38_v13 = vpop.permute.xlu1 %37  }
  0x7d   :  { %34 = vst.msk [vmem:[#allocation0] sm:$0x1] %vm33_vm5, %v32_v12  }
  0x7e   :  { %40 = vst.msk [vmem:[#allocation0] sm:$0x1] %vm39_vm6, %v38_v13  }
  0x80   :  { %v44_v14 = vpop.permute.xlu0 %43  }
  0x81   :  { %46 = vst.msk [vmem:[#allocation0] sm:$0x1] %vm45_vm7, %v44_v14  }
  0x88   :  { %v50_v15 = vld [vmem:[#allocation0] sm:$0x1] }
  0x89   :  { %52 = vst [vmem:[%s112_s1] sm:$0x1] %v50_v15 }

// kernel: sgc_forward.1
= control target key start
LH: loop header
LB: loop body
LE: loop exit
PB: predicated region body
PF: predicated region fallthrough
CT: control target
= control target key end

     0   :  { %s402_s1 = inlined_call_operand.vmem [shape: f32[256,128], index: 1, kind: input, shape index: {}]   ;;  %s403_s0 = inlined_call_operand.vmem [shape: f32[26,256], index: 0, kind: input, shape index: {}]   ;;  %s404_s2 = inlined_call_operand.vmem [shape: f32[1,128], index: 2, kind: input, shape index: {}]   ;;  %s405_s3 = inlined_call_operand.vmem [shape: f32[26,128], index: 3, kind: output, shape index: {}]  }
   0x1   :  { %v38_v0 = vld [vmem:[%s402_s1 + $0x80] sm:$0xff]  ;;  %v39_v1 = vld [vmem:[%s402_s1 + $0x88] sm:$0xff]  ;;  %v40_v5 = vld [vmem:[%s402_s1 + $0x90] sm:$0xff] }
   0x2   :  { %v22_v2 = vld [vmem:[%s402_s1] sm:$0xff]  ;;  %v199_v3 = vpack.c.bf16 %v39_v1, %v38_v0  ;;  %v23_v4 = vld [vmem:[%s402_s1 + $0x8] sm:$0xff]  ;;  %v41_v6 = vld [vmem:[%s402_s1 + $0x98] sm:$0xff] }
   0x3   :  { %v201_v7 = vpack.c.bf16 %v23_v4, %v22_v2  ;;  %v203_v8 = vpack.c.bf16 %v41_v6, %v40_v5  ;;  %v24_v9 = vld [vmem:[%s402_s1 + $0x10] sm:$0xff]  ;;  %v25_v10 = vld [vmem:[%s402_s1 + $0x18] sm:$0xff]  ;;  %v42_v11 = vld [vmem:[%s402_s1 + $0xa0] sm:$0xff] }
   0x4   :  { %200 = vmatprep.subr.bf16.mxu0 %v199_v3  ;;  %231 = vmatprep.subr.bf16.mxu1 %v199_v3  ;;  %v43_v12 = vld [vmem:[%s402_s1 + $0xa8] sm:$0xff]  ;;  %v205_v13 = vpack.c.bf16 %v25_v10, %v24_v9  ;;  %v26_v15 = vld [vmem:[%s402_s1 + $0x20] sm:$0xff]  ;;  %v44_v17 = vld [vmem:[%s402_s1 + $0xb0] sm:$0xff] }
   0x5   :  { %202 = vmatpush3.bf16.msra.mxu0 %v201_v7  ;;  %239 = vmatpush3.bf16.msra.mxu1 %v201_v7  ;;  %v207_v14 = vpack.c.bf16 %v43_v12, %v42_v11  ;;  %v27_v16 = vld [vmem:[%s402_s1 + $0x28] sm:$0xff]  ;;  %v45_v18 = vld [vmem:[%s402_s1 + $0xb8] sm:$0xff]  ;;  %v28_v21 = vld [vmem:[%s402_s1 + $0x30] sm:$0xff] }
   0x6   :  { %204 = vmatprep.subr.bf16.mxu0 %v203_v8  ;;  %232 = vmatprep.subr.bf16.mxu1 %v203_v8  ;;  %v209_v19 = vpack.c.bf16 %v27_v16, %v26_v15  ;;  %v211_v20 = vpack.c.bf16 %v45_v18, %v44_v17  ;;  %v29_v22 = vld [vmem:[%s402_s1 + $0x38] sm:$0xff]  ;;  %v46_v23 = vld [vmem:[%s402_s1 + $0xc0] sm:$0xff]  ;;  %v47_v24 = vld [vmem:[%s402_s1 + $0xc8] sm:$0xff] }
   0x7   :  { %v15_v25 = vld [vmem:[%s403_s0 + $0x8] sm:$0xff]  ;;  %v213_v27 = vpack.c.bf16 %v29_v22, %v28_v21  ;;  %v215_v28 = vpack.c.bf16 %v47_v24, %v46_v23  ;;  %v30_v29 = vld [vmem:[%s402_s1 + $0x40] sm:$0xff]  ;;  %v48_v31 = vld [vmem:[%s402_s1 + $0xd0] sm:$0xff] }
   0x8   :  { %125 = vmatprep.mubr.f32.mxu0 %v15_v25  ;;  %v19_v26 = vld [vmem:[%s403_s0 + $0x28] sm:$0xff]  ;;  %v49_v32 = vld [vmem:[%s402_s1 + $0xd8] sm:$0xff]  ;;  %v32_v35 = vld [vmem:[%s402_s1 + $0x50] sm:$0xff] }
   0x9   :  { %206 = vmatpush3.bf16.msra.mxu0 %v205_v13  ;;  %240 = vmatpush3.bf16.msra.mxu1 %v205_v13  ;;  %v31_v30 = vld [vmem:[%s402_s1 + $0x48] sm:$0xff]  ;;  %v219_v34 = vpack.c.bf16 %v49_v32, %v48_v31  ;;  %v33_v36 = vld [vmem:[%s402_s1 + $0x58] sm:$0xff]  ;;  %v50_v37 = vld [vmem:[%s402_s1 + $0xe0] sm:$0xff] }
   0xa   :  { %208 = vmatprep.subr.bf16.mxu0 %v207_v14  ;;  %233 = vmatprep.subr.bf16.mxu1 %v207_v14  ;;  %v217_v33 = vpack.c.bf16 %v31_v30, %v30_v29  ;;  %v51_v38 = vld [vmem:[%s402_s1 + $0xe8] sm:$0xff]  ;;  %v221_v39 = vpack.c.bf16 %v33_v36, %v32_v35  ;;  %v34_v41 = vld [vmem:[%s402_s1 + $0x60] sm:$0xff]  ;;  %v52_v43 = vld [vmem:[%s402_s1 + $0xf0] sm:$0xff] }
   0xb   :  { %135 = vmatprep.mubr.f32.mxu1 %v19_v26  ;;  %v223_v40 = vpack.c.bf16 %v51_v38, %v50_v37  ;;  %v35_v42 = vld [vmem:[%s402_s1 + $0x68] sm:$0xff]  ;;  %v53_v44 = vld [vmem:[%s402_s1 + $0xf8] sm:$0xff]  ;;  %v36_v47 = vld [vmem:[%s402_s1 + $0x70] sm:$0xff] }
   0xc   :  { %v225_v45 = vpack.c.bf16 %v35_v42, %v34_v41  ;;  %v227_v46 = vpack.c.bf16 %v53_v44, %v52_v43  ;;  %v37_v48 = vld [vmem:[%s402_s1 + $0x78] sm:$0xff]  ;;  %v14_v50 = vld [vmem:[%s403_s0] sm:$0xff]  ;;  %v16_v54 = vld [vmem:[%s403_s0 + $0x10] sm:$0xff] }
   0xd   :  { %210 = vmatpush3.bf16.msra.mxu0 %v209_v19  ;;  %241 = vmatpush3.bf16.msra.mxu1 %v209_v19  ;;  %v229_v49 = vpack.c.bf16 %v37_v48, %v36_v47  ;;  %v18_v51 = vld [vmem:[%s403_s0 + $0x20] sm:$0xff]  ;;  %v17_v52 = vld [vmem:[%s403_s0 + $0x18] sm:$0xff]  ;;  %v20_v55 = vld [vmem:[%s403_s0 + $0x30] sm:$0x3] }
   0xe   :  { %212 = vmatprep.subr.bf16.mxu0 %v211_v20  ;;  %234 = vmatprep.subr.bf16.mxu1 %v211_v20  ;;  %v21_v53 = vld [vmem:[%s403_s0 + $0x38] sm:$0x3]  ;;  %v154_v58 = vld [vmem:[%s404_s2] ss:$0 sm:$0xff] }
  0x11   :  { %214 = vmatpush3.bf16.msra.mxu0 %v213_v27  ;;  %242 = vmatpush3.bf16.msra.mxu1 %v213_v27 }
  0x12   :  { %216 = vmatprep.subr.bf16.mxu0 %v215_v28  ;;  %235 = vmatprep.subr.bf16.mxu1 %v215_v28 }
  0x15   :  { %218 = vmatpush3.bf16.msra.mxu0 %v217_v33  ;;  %243 = vmatpush3.bf16.msra.mxu1 %v217_v33 }
  0x16   :  { %220 = vmatprep.subr.bf16.mxu0 %v219_v34  ;;  %236 = vmatprep.subr.bf16.mxu1 %v219_v34 }
  0x19   :  { %222 = vmatpush3.bf16.msra.mxu0 %v221_v39  ;;  %244 = vmatpush3.bf16.msra.mxu1 %v221_v39 }
  0x1a   :  { %224 = vmatprep.subr.bf16.mxu0 %v223_v40  ;;  %237 = vmatprep.subr.bf16.mxu1 %v223_v40 }
  0x1d   :  { %226 = vmatpush3.bf16.msra.mxu0 %v225_v45  ;;  %245 = vmatpush3.bf16.msra.mxu1 %v225_v45 }
  0x1e   :  { %228 = vmatprep.subr.bf16.mxu0 %v227_v46  ;;  %238 = vmatprep.subr.bf16.mxu1 %v227_v46 }
  0x21   :  { %230 = vmatpush3.bf16.msra.mxu0 %v229_v49  ;;  %246 = vmatpush3.bf16.msra.mxu1 %v229_v49 }
  0x24   :  { %126 = vmatmul.mubr.f32.vlgmr.msra.gmra.mrb[0].mxu0 %v14_v50  ;;  %136 = vmatmul.mubr.f32.vlgmr.msra.gmra.mrb[0].mxu1 %v18_v51 }
  0x25   :  { %130 = vmatprep.mubr.f32.mxu0 %v17_v52  ;;  %140 = vmatprep.mubr.f32.mxu1 %v21_v53 }
  0x28   :  { %131 = vmatmul.mubr.f32.gmra.mrb[2].mxu0 %v16_v54  ;;  %141 = vmatmul.mubr.f32.gmra.mrb[2].mxu1 %v20_v55 }
  0xf7   :  { %v187_v56 = vpop.f32.mrb[0].mxu0  ;;  %v193_v57 = vpop.f32.mrb[0].mxu1 }
  0xf8   :  { %v188_v59 = vpop.f32.mrb[1].mxu0  ;;  %v194_v60 = vpop.f32.mrb[1].mxu1 }
  0xf9   :  { %v189_v61 = vadd.f32 %v188_v59, %v187_v56  ;;  %v195_v62 = vadd.f32 %v194_v60, %v193_v57 }
  0xfb   :  { %v128_v63 = vadd.f32 %v189_v61, %v154_v58  ;;  %v138_v0 = vadd.f32 %v195_v62, %v154_v58  ;;  %v190_v1 = vpop.f32.mrb[2].mxu0  ;;  %v196_v2 = vpop.f32.mrb[2].mxu1 }
  0xfc   :  { %v191_v3 = vpop.f32.mrb[3].mxu0  ;;  %v197_v4 = vpop.f32.mrb[3].mxu1 }
  0xfd   :  { %146 = vst [vmem:[%s405_s3] sm:$0xff] %v128_v63  ;;  %148 = vst [vmem:[%s405_s3 + $0x10] sm:$0xff] %v138_v0  ;;  %v192_v5 = vadd.f32 %v191_v3, %v190_v1  ;;  %v198_v6 = vadd.f32 %v197_v4, %v196_v2 }
  0xff   :  { %v133_v7 = vadd.f32 %v192_v5, %v154_v58  ;;  %v143_v8 = vadd.f32 %v198_v6, %v154_v58 }
 0x101   :  { %147 = vst [vmem:[%s405_s3 + $0x8] sm:$0xff] %v133_v7  ;;  %149 = vst [vmem:[%s405_s3 + $0x18] sm:$0x3] %v143_v8 }

</bundles_post_ra>
